<compile_context>
chip_gen: v6e
topology: v6e:2x2x1
jax: 0.10.0
libtpu: 0.0.40
codegen_flags: <defaults>
</compile_context>

<pallas_src>
import functools

import numpy as np
import jax
import jax.numpy as jnp
from jax import lax
from jax.experimental import pallas as pl
from jax.experimental.pallas import tpu as pltpu


def _cdiv(a, b):
    return -(-a // b)


def _round_up(a, b):
    return _cdiv(a, b) * b


def _wants_f32_compute():
    """v5e and older chips have no bf16 VALU -> keep the morphology math in f32 there."""
    try:
        kind = jax.devices()[0].device_kind.lower()
    except Exception:
        return True
    return any(t in kind for t in ("v2", "v3", "v4", "v5"))


def _opening_loss_kernel(x_ref, o_ref, *, h, w, radius, planes, work_dtype):
    """One grid step: a (pb, h*w) slab of flattened planes -> per-block partial SSE."""
    pb, L = x_ref.shape

    x = x_ref[...].astype(work_dtype)                       # in-kernel cast (bf16 stays bf16)

    # Rows past `planes` (partial last block) are zeroed so they contribute exactly 0.
    if planes % pb != 0:
        row = lax.broadcasted_iota(jnp.int32, (pb, 1), 0)
        grow = pl.program_id(0) * pb + row
        x = jnp.where(grow < planes, x, 0.0)

    big = float(jnp.finfo(work_dtype).max)

    # Lane-position indices shared by every boundary mask (built once per grid step).
    t_idx = lax.broadcasted_iota(jnp.int32, (1, L), 1)      # flat index within a plane
    if (w & (w - 1)) == 0:
        j_idx = jnp.bitwise_and(t_idx, w - 1)               # column index, W power of two
    else:                                                   # column index via cond-subtract
        j_idx = t_idx
        for s in range(max(0, (h - 1).bit_length() - 1), -1, -1):
            m = w << s
            j_idx = jnp.where(j_idx >= m, j_idx - m, j_idx)

    def tap(arr, d, pos, period, unit, pad):
        """result[t] = arr[t + d*unit]; taps outside the plane / row are replaced by pad."""
        if d == 0:
            return arr
        fd = d * unit
        s = pltpu.roll(arr, shift=(-fd) % L, axis=1)        # XLU lane rotate
        invalid = (pos < -fd) if d < 0 else (pos >= period - fd)
        return jnp.where(invalid, pad, s)

    def window_reduce(arr, lo, hi, pos, period, unit, reducer, pad):
        """Running min/max over contiguous offsets [lo, hi] (log-doubling, O(log r) taps)."""
        fwd, cov = arr, 1                                    # forward half: offsets [0, hi]
        while cov < hi + 1:
            step = min(cov, hi + 1 - cov)
            fwd = reducer(fwd, tap(fwd, step, pos, period, unit, pad))
            cov += step
        if lo == 0:
            return fwd
        m_b = -lo                                            # backward half: offsets [lo, -1]
        bwd, cov = tap(arr, -1, pos, period, unit, pad), 1
        while cov < m_b:
            step = min(cov, m_b - cov)
            bwd = reducer(bwd, tap(bwd, -step, pos, period, unit, pad))
            cov += step
        return reducer(fwd, bwd)

    # scipy grey_erosion(size=r): offsets [-(r//2), r-1-r//2]; grey_dilation is the mirror.
    # TODO(synk): even-radius origin convention mirrors scipy's grey_dilation origin shift;
    # validated against the symmetric-pad NumPy reference below, not against scipy itself.
    lo_e, hi_e = -(radius // 2), radius - 1 - radius // 2
    lo_d, hi_d = -(radius - 1 - radius // 2), radius // 2

    er = window_reduce(x,  lo_e, hi_e, t_idx, L, w, jnp.minimum, big)    # erosion  along H
    er = window_reduce(er, lo_e, hi_e, j_idx, w, 1, jnp.minimum, big)    # erosion  along W
    op = window_reduce(er, lo_d, hi_d, t_idx, L, w, jnp.maximum, -big)   # dilation along H
    op = window_reduce(op, lo_d, hi_d, j_idx, w, 1, jnp.maximum, -big)   # dilation along W

    diff = x.astype(jnp.float32) - op.astype(jnp.float32)
    sq = diff * diff

    if pb % 8 == 0 and pb > 8:                               # fold planes -> 8 rows (VPU adds)
        acc = sq[0:8, :]
        for g in range(1, pb // 8):
            acc = acc + sq[g * 8:(g + 1) * 8, :]
        sq = acc
    o_ref[...] = jnp.sum(sq, axis=-1, keepdims=True)         # lane reduce -> (rows, 1) partial


@functools.partial(jax.jit, static_argnames=("radius",))
def opening_loss_2d(labels, *args, radius=2):
    """Pallas TPU equivalent of OpeningLoss2D.forward (extra args are ignored)."""
    del args
    n, c, h, w = labels.shape
    assert 1 <= radius <= min(h, w), "radius must not exceed the plane extent"
    planes = n * c
    L = h * w
    total = planes * L

    # Flattened (plane, h*w) view: pure dim-merge (no HBM copy), lane-dense for h*w >= 128.
    x = labels.reshape(planes, L)

    work_dtype = (jnp.bfloat16
                  if (labels.dtype == jnp.bfloat16 and not _wants_f32_compute())
                  else jnp.float32)

    # ---- generation-aware block sizing --------------------------------------------------
    try:
        vmem_cap = int(pltpu.get_tpu_info().vmem_capacity_bytes)   # 64 MiB v7x, 128 MiB v5e/v6e
    except Exception:
        vmem_cap = 64 * 1024 * 1024
    vmem_limit = max(32 * 1024 * 1024, min(64 * 1024 * 1024, (vmem_cap * 3) // 4))
    budget = min(24 * 1024 * 1024, vmem_limit // 2)

    lane_row = _round_up(L, 128)
    in_row = lane_row * labels.dtype.itemsize
    work_row = lane_row * (2 if work_dtype == jnp.bfloat16 else 4)
    per_plane = 2 * in_row + 8 * work_row        # double-buffered input + live work-dtype temps

    if planes <= 8:
        pb = planes                               # block equals the (small) full plane axis
    else:
        pb = min(planes,
                 max(1, budget // per_plane),                       # VMEM budget
                 max(1, (2 * 1024 * 1024) // max(1, in_row)),       # ~2 MiB input per block
                 256)                                               # bound in-kernel row-fold
        pb = max(8, (pb // 8) * 8)                                  # sublane-aligned rows
        # v7x megacore: keep >= 2 blocks so the "parallel" axis can shard across both cores.
        pb = min(pb, max(8, _round_up(_cdiv(planes, 2), 8)))
    num_blocks = _cdiv(planes, pb)
    out_rows = 8 if (pb % 8 == 0 and pb >= 8) else pb

    kernel = functools.partial(_opening_loss_kernel, h=h, w=w, radius=radius,
                               planes=planes, work_dtype=work_dtype)

    partials = pl.pallas_call(
        kernel,
        out_shape=jax.ShapeDtypeStruct((num_blocks, out_rows, 1), jnp.float32),
        grid=(num_blocks,),
        in_specs=[pl.BlockSpec((pb, L), lambda i: (i, 0))],
        out_specs=pl.BlockSpec((None, out_rows, 1), lambda i: (i, 0, 0)),
        compiler_params=pltpu.CompilerParams(
            dimension_semantics=("parallel",),
            vmem_limit_bytes=int(vmem_limit)),
        cost_estimate=pl.CostEstimate(
            flops=int(total) * (8 * radius + 3),
            transcendentals=0,
            bytes_accessed=int(total) * labels.dtype.itemsize + num_blocks * out_rows * 4),
    )(x)

    # Tiny deferred reduction + mean scale (hierarchical f32 sum: row -> block -> total).
    return jnp.sum(partials) / jnp.float32(total)


# ---- independent NumPy reference implementing scipy.ndimage.grey_opening semantics ----
def _ref_opening_loss(x_np, radius):
    x_np = np.asarray(x_np, dtype=np.float32)
    n, c, h, w = x_np.shape

    def win_reduce(a, lo, hi, red):
        ap = np.pad(a, ((lo, hi), (lo, hi)), mode="symmetric")
        out = None
        for di in range(radius):
            for dj in range(radius):
                win = ap[di:di + h, dj:dj + w]
                out = win if out is None else red(out, win)
        return out

    lo_e, hi_e = radius // 2, radius - 1 - radius // 2
    lo_d, hi_d = radius - 1 - radius // 2, radius // 2
    sm = np.empty_like(x_np)
    for i in range(n):
        for j in range(c):
            er = win_reduce(x_np[i, j], lo_e, hi_e, np.minimum)
            sm[i, j] = win_reduce(er, lo_d, hi_d, np.maximum)
    return np.mean((x_np - sm) ** 2)


if __name__ == "__main__":
    key = jax.random.PRNGKey(0)
    labels = jax.random.uniform(key, (2, 4, 16, 16), dtype=jnp.float32)

    # Primary check: module default radius=2.
    loss = jax.block_until_ready(opening_loss_2d(labels, radius=2))
    ref = _ref_opening_loss(np.asarray(labels), radius=2)
    assert np.allclose(np.asarray(loss), ref, rtol=1e-5, atol=1e-6), (float(loss), float(ref))

    # Odd radius + log-doubling running-min/max paths.
    for r in (3, 5):
        got = jax.block_until_ready(opening_loss_2d(labels, radius=r))
        want = _ref_opening_loss(np.asarray(labels), radius=r)
        assert np.allclose(np.asarray(got), want, rtol=1e-5, atol=1e-6), (r, float(got), float(want))

    # Partial last grid block (planes % pb != 0) + in-kernel row folding (pb > 8).
    labels2 = jax.random.uniform(jax.random.PRNGKey(1), (2, 10, 8, 16), dtype=jnp.float32)
    got2 = jax.block_until_ready(opening_loss_2d(labels2, radius=3))
    want2 = _ref_opening_loss(np.asarray(labels2), radius=3)
    assert np.allclose(np.asarray(got2), want2, rtol=1e-5, atol=1e-6), (float(got2), float(want2))

    print("KERNEL_OK")
</pallas_src>

<mosaic_0001>
module attributes {stable_mosaic.version = 11 : i64} {
  func.func @_opening_loss_kernel(%arg0: i32, %arg1: memref<8x256xf32, #tpu.memory_space<vmem>>, %arg2: memref<1x8x1xf32, #tpu.memory_space<vmem>>) attributes {dimension_semantics = [#tpu.dimension_semantics<parallel>], iteration_bounds = array<i64: 1>, scalar_prefetch = 0 : i64, scratch_operands = 0 : i64, tpu.core_type = #tpu.core_type<tc>, window_params = [{transform_indices = @transform_0, window_bounds = array<i64: 8, 256>}, {transform_indices = @transform_1, window_bounds = array<i64: 1, 8, 1>}]} {
    %c0 = arith.constant 0 : index
    %c0_0 = arith.constant 0 : index
    %0 = vector.load %arg1[%c0, %c0_0] : memref<8x256xf32, #tpu.memory_space<vmem>>, vector<8x256xf32>
    %1 = tpu.iota {dimensions = array<i32: 1>} : vector<1x256xi32>
    %c15_i32 = arith.constant 15 : i32
    %2 = vector.broadcast %c15_i32 : i32 to vector<1x256xi32>
    %3 = arith.andi %1, %2 : vector<1x256xi32>
    %c16_i32 = arith.constant 16 : i32
    %4 = tpu.dynamic_rotate %0 by %c16_i32 dim 1 : vector<8x256xf32>, i32 -> vector<8x256xf32>
    %c16_i32_1 = arith.constant 16 : i32
    %5 = vector.broadcast %c16_i32_1 : i32 to vector<1x256xi32>
    %6 = arith.cmpi slt, %1, %5 : vector<1x256xi32>
    %cst = arith.constant 3.40282347E+38 : f32
    %7 = vector.shape_cast %6 : vector<1x256xi1> to vector<1x256xi1>
    %8 = vector.broadcast %7 : vector<1x256xi1> to vector<8x256xi1>
    %9 = vector.broadcast %cst : f32 to vector<8x256xf32>
    %10 = arith.select %8, %9, %4 : vector<8x256xi1>, vector<8x256xf32>
    %11 = arith.minimumf %0, %10 : vector<8x256xf32>
    %c1_i32 = arith.constant 1 : i32
    %12 = tpu.dynamic_rotate %11 by %c1_i32 dim 1 : vector<8x256xf32>, i32 -> vector<8x256xf32>
    %c1_i32_2 = arith.constant 1 : i32
    %13 = vector.broadcast %c1_i32_2 : i32 to vector<1x256xi32>
    %14 = arith.cmpi slt, %3, %13 : vector<1x256xi32>
    %cst_3 = arith.constant 3.40282347E+38 : f32
    %15 = vector.shape_cast %14 : vector<1x256xi1> to vector<1x256xi1>
    %16 = vector.broadcast %15 : vector<1x256xi1> to vector<8x256xi1>
    %17 = vector.broadcast %cst_3 : f32 to vector<8x256xf32>
    %18 = arith.select %16, %17, %12 : vector<8x256xi1>, vector<8x256xf32>
    %19 = arith.minimumf %11, %18 : vector<8x256xf32>
    %c240_i32 = arith.constant 240 : i32
    %20 = tpu.dynamic_rotate %19 by %c240_i32 dim 1 : vector<8x256xf32>, i32 -> vector<8x256xf32>
    %c240_i32_4 = arith.constant 240 : i32
    %21 = vector.broadcast %c240_i32_4 : i32 to vector<1x256xi32>
    %22 = arith.cmpi sge, %1, %21 : vector<1x256xi32>
    %cst_5 = arith.constant -3.40282347E+38 : f32
    %23 = vector.shape_cast %22 : vector<1x256xi1> to vector<1x256xi1>
    %24 = vector.broadcast %23 : vector<1x256xi1> to vector<8x256xi1>
    %25 = vector.broadcast %cst_5 : f32 to vector<8x256xf32>
    %26 = arith.select %24, %25, %20 : vector<8x256xi1>, vector<8x256xf32>
    %27 = arith.maximumf %19, %26 : vector<8x256xf32>
    %c255_i32 = arith.constant 255 : i32
    %28 = tpu.dynamic_rotate %27 by %c255_i32 dim 1 : vector<8x256xf32>, i32 -> vector<8x256xf32>
    %c15_i32_6 = arith.constant 15 : i32
    %29 = vector.broadcast %c15_i32_6 : i32 to vector<1x256xi32>
    %30 = arith.cmpi sge, %3, %29 : vector<1x256xi32>
    %cst_7 = arith.constant -3.40282347E+38 : f32
    %31 = vector.shape_cast %30 : vector<1x256xi1> to vector<1x256xi1>
    %32 = vector.broadcast %31 : vector<1x256xi1> to vector<8x256xi1>
    %33 = vector.broadcast %cst_7 : f32 to vector<8x256xf32>
    %34 = arith.select %32, %33, %28 : vector<8x256xi1>, vector<8x256xf32>
    %35 = arith.maximumf %27, %34 : vector<8x256xf32>
    %36 = arith.subf %0, %35 : vector<8x256xf32>
    %37 = arith.mulf %36, %36 : vector<8x256xf32>
    %cst_8 = arith.constant dense<0.000000e+00> : vector<8xf32>
    %38 = vector.multi_reduction <add>, %37, %cst_8 [1] : vector<8x256xf32> to vector<8xf32>
    %39 = vector.shape_cast %38 : vector<8xf32> to vector<8x1xf32>
    %c0_9 = arith.constant 0 : index
    %c0_10 = arith.constant 0 : index
    %c0_11 = arith.constant 0 : index
    %40 = vector.load %arg2[%c0_9, %c0_10, %c0_11] : memref<1x8x1xf32, #tpu.memory_space<vmem>>, vector<1x8x1xf32>
    %41 = vector.shape_cast %40 : vector<1x8x1xf32> to vector<8x1xf32>
    %42 = vector.shape_cast %39 : vector<8x1xf32> to vector<1x8x1xf32>
    tpu.vector_store %arg2[%c0_9, %c0_10, %c0_11], %42 {strides = array<i32>} : memref<1x8x1xf32, #tpu.memory_space<vmem>>, vector<1x8x1xf32>,
    return
  }
  func.func @transform_0(%arg0: i32) -> (i32, i32) {
    %c0_i32 = arith.constant 0 : i32
    %c0_i32_0 = arith.constant 0 : i32
    return %arg0, %c0_i32 : i32, i32
  }
  func.func @transform_1(%arg0: i32) -> (i32, i32, i32) {
    %c0_i32 = arith.constant 0 : i32
    %c0_i32_0 = arith.constant 0 : i32
    %c0_i32_1 = arith.constant 0 : i32
    return %arg0, %c0_i32, %c0_i32_0 : i32, i32, i32
  }
}

</mosaic_0001>

<bundles_post_ra>
// kernel: opening_loss_2d.1
= control target key start
LH: loop header
LB: loop body
LE: loop exit
PB: predicated region body
PF: predicated region fallthrough
CT: control target
= control target key end

     0   :  { %s99_s8 = smov 16   ;;  %v10_v2 = vlaneseq  ;;  %s100_s11 = smov 1   ;;  %vm89_vm9 = vcmask 7168   ;;  %s122_s0 = inlined_call_operand.vmem [shape: f32[8,256], index: 0, kind: input, shape index: {}]   ;;  %s123_s1 = inlined_call_operand.vmem [shape: f32[1,8,1], index: 1, kind: output, shape index: {}]  }
   0x1   :  { %v8_v0 = vld [vmem:[%s122_s0] sm:$0xff]  ;;  %v9_v1 = vld [vmem:[%s122_s0 + $0x8] sm:$0xff]  ;;  %s101_s0 = smov 112   ;;  %s102_s12 = smov 127  }
   0x2   :  { %15 = vrot.lane.b32.xlu0 %v8_v0, %s99_s8  ;;  %v11_v3 = vand.u32 127, %v10_v2 }
   0x4   :  { %vm19_vm0 = vcmp.lt.s32.totalorder %v11_v3, 16  ;;  %v12_v11 = vadd.s32 128, %v11_v3  ;;  %v13_v12 = vand.u32 15, %v11_v3  ;;  %vm35_vm1 = vcmp.lt.s32.totalorder %v11_v3, 1 }
   0x5   :  { %vm52_vm4 = vcmp.lt.s32.totalorder %v11_v3, 112  ;;  %vm69_vm6 = vcmp.lt.s32.totalorder %v11_v3, 127 }
   0x6   :  { %17 = vrot.lane.b32.xlu0 %v9_v1, %s99_s8  ;;  %v14_v13 = vand.u32 15, %v12_v11  ;;  %vm38_vm2 = vcmp.lt.s32.totalorder %v13_v12, 1  ;;  %vm56_vm5 = vcmp.ge.s32.totalorder %v12_v11, 240  ;;  %vm72_vm7 = vcmp.ge.s32.totalorder %v13_v12, 15 }
   0x8   :  { %vm39_vm3 = vcmp.lt.s32.totalorder %v14_v13, 1  ;;  %vm73_vm8 = vcmp.ge.s32.totalorder %v14_v13, 15 }
  0x74   :  { %v16_v4 = vpop.permute.xlu0 %15 }
  0x78   :  { %v18_v5 = vpop.permute.xlu0 %17 }
  0x79   :  { %v21_v6 = vsel %vm19_vm0, %v18_v5, %v16_v4  ;;  %v20_v9 = vsel %vm19_vm0, %v16_v4, %v18_v5 }
  0x7a   :  { %v27_v7 = vsel %vm19_vm0, 3.4028235e+38, %v21_v6  ;;  %v30_v10 = vmin.f32 %v9_v1, %v20_v9 }
  0x7b   :  { %v29_v8 = vmin.f32 %v8_v0, %v27_v7 }
  0x7d   :  { %31 = vrot.lane.b32.xlu1 %v29_v8, %s100_s11 }
  0x81   :  { %33 = vrot.lane.b32.xlu1 %v30_v10, %s100_s11 }
  0xef   :  { %v32_v14 = vpop.permute.xlu1 %31 }
  0xf3   :  { %v34_v15 = vpop.permute.xlu1 %33 }
  0xf4   :  { %v36_v16 = vsel %vm35_vm1, %v32_v14, %v34_v15  ;;  %v37_v17 = vsel %vm35_vm1, %v34_v15, %v32_v14 }
  0xf5   :  { %v44_v18 = vsel %vm38_vm2, 3.4028235e+38, %v37_v17  ;;  %v45_v19 = vsel %vm39_vm3, 3.4028235e+38, %v36_v16 }
  0xf6   :  { %v46_v20 = vmin.f32 %v29_v8, %v44_v18  ;;  %v47_v21 = vmin.f32 %v30_v10, %v45_v19 }
  0xf8   :  { %48 = vrot.lane.b32.xlu0 %v46_v20, %s101_s0  ;;  %50 = vrot.lane.b32.xlu1 %v47_v21, %s101_s0 }
 0x16a   :  { %v49_v22 = vpop.permute.xlu0 %48  ;;  %v51_v23 = vpop.permute.xlu1 %50 }
 0x16b   :  { %v53_v24 = vsel %vm52_vm4, %v49_v22, %v51_v23  ;;  %v54_v25 = vsel %vm52_vm4, %v51_v23, %v49_v22 }
 0x16c   :  { %v62_v26 = vsel %vm56_vm5, -3.4028235e+38, %v54_v25  ;;  %v63_v27 = vmax.f32 %v46_v20, %v53_v24 }
 0x16d   :  { %v64_v28 = vmax.f32 %v47_v21, %v62_v26 }
 0x16e   :  { %65 = vrot.lane.b32.xlu0 %v63_v27, %s102_s12 }
 0x16f   :  { %67 = vrot.lane.b32.xlu1 %v64_v28, %s102_s12 }
 0x1e0   :  { %v66_v29 = vpop.permute.xlu0 %65 }
 0x1e1   :  { %v68_v30 = vpop.permute.xlu1 %67 }
 0x1e2   :  { %v70_v31 = vsel %vm69_vm6, %v66_v29, %v68_v30  ;;  %v71_v32 = vsel %vm69_vm6, %v68_v30, %v66_v29 }
 0x1e3   :  { %v78_v33 = vsel %vm72_vm7, -3.4028235e+38, %v70_v31  ;;  %v79_v34 = vsel %vm73_vm8, -3.4028235e+38, %v71_v32 }
 0x1e4   :  { %v80_v35 = vmax.f32 %v63_v27, %v78_v33  ;;  %v81_v36 = vmax.f32 %v64_v28, %v79_v34 }
 0x1e6   :  { %v82_v37 = vsub.f32 %v8_v0, %v80_v35  ;;  %v83_v38 = vsub.f32 %v9_v1, %v81_v36 }
 0x1e8   :  { %v84_v39 = vmul.f32 %v82_v37, %v82_v37  ;;  %v85_v40 = vmul.f32 %v83_v38, %v83_v38 }
 0x1ea   :  { %v86_v41 = vadd.f32 %v85_v40, %v84_v39 }
 0x1ec   :  { %87 = vadd.xlane.f32.xlu0 %v86_v41 }
 0x275   :  { %v88_v42 = vpop.xlane.xlu0 %87 }
 0x276   :  { %90 = vst.msk [vmem:[%s123_s1] sm:$0xff] %vm89_vm9, %v88_v42 }

</bundles_post_ra>
